<compile_context>
chip_gen: v7x
topology: tpu7x:2x2x1
jax: 0.10.0
libtpu: 0.0.40
codegen_flags: <defaults>
</compile_context>

<pallas_src>
import functools

import jax
import jax.numpy as jnp
from jax import lax
from jax.experimental import pallas as pl
from jax.experimental.pallas import tpu as pltpu


def _round_up(x, m):
    return (x + m - 1) // m * m


def _mlp_kernel(n_hidden, num_users_p, num_items_p, *refs):
    """refs = (uid, iid, Au, Ai, b0, [W_k, b_k]*, w_out, b_out, out_ref)."""
    uid_ref, iid_ref, au_ref, ai_ref, b0_ref = refs[:5]
    hidden = refs[5:-3]
    wout_ref, bout_ref, out_ref = refs[-3], refs[-2], refs[-1]

    tile_b = uid_ref.shape[1]

    # Fused embedding gather: one-hot (vocab, tile_b) bf16 matmul against the
    # VMEM-resident folded tables.  Batch stays on the lane axis throughout.
    uids = uid_ref[...]                                    # (1, tile_b) int32
    iids = iid_ref[...]
    oh_u = (lax.broadcasted_iota(jnp.int32, (num_users_p, tile_b), 0)
            == uids).astype(au_ref.dtype)                  # (Up, tile_b) bf16
    oh_i = (lax.broadcasted_iota(jnp.int32, (num_items_p, tile_b), 0)
            == iids).astype(ai_ref.dtype)                  # (Ip, tile_b) bf16

    # First hidden layer: concat + Linear folded into the tables.
    x = (jnp.dot(au_ref[...], oh_u, preferred_element_type=jnp.float32)
         + jnp.dot(ai_ref[...], oh_i, preferred_element_type=jnp.float32)
         + b0_ref[...])                                    # (H1, tile_b) f32
    x = jnp.maximum(x, 0.0)

    # Remaining hidden layers: bf16 MXU dots, f32 accumulate + bias + ReLU.
    for k in range(n_hidden - 1):
        w = hidden[2 * k][...]                             # (out, in) bf16
        b = hidden[2 * k + 1][...]                         # (out, 1)  f32
        x = jnp.dot(w, x.astype(w.dtype),
                    preferred_element_type=jnp.float32) + b
        x = jnp.maximum(x, 0.0)

    # Output layer (H_last -> 1) on the VPU + sublane reduce: avoids an M=1
    # MXU matmul and yields the lane-dense (1, tile_b) logits row directly.
    w_out = wout_ref[...]                                  # (H_last, 1) f32
    logits = jnp.sum(x * w_out, axis=0, keepdims=True) + bout_ref[...]
    out_ref[...] = logits.astype(out_ref.dtype)


def _vmem_limit_bytes():
    try:
        cap = pltpu.get_tpu_info().vmem_capacity_bytes
    except Exception:
        cap = 64 * 1024 * 1024        # conservative (v7x-sized) fallback
    # ~75% of physical VMEM: ~96 MiB on v5e/v6e (128 MiB), ~48 MiB on v7x.
    return min(int(cap) * 3 // 4, 100 * 1024 * 1024)


def _pick_tile_b(batch, nu_p, ni_p, widths, vmem_limit):
    # Bigger tiles on the 128 MiB-VMEM generations (v5e/v6e), smaller on v7x.
    target = 16384 if vmem_limit >= (80 << 20) else 8192
    # Rough per-row VMEM bytes: double-buffered ids + logits blocks (8-sublane
    # padded), bf16 one-hot temporaries, f32 activation chain (+bf16 copies).
    per_row = 3 * 2 * 32 + 2 * (nu_p + ni_p) + 12 * max(widths)
    cap = max(128, (vmem_limit // 2 // per_row) // 128 * 128)
    return max(128, min(_round_up(batch, 128), target, cap))


def mlp_forward(user_table, item_table, params, user_ids, item_ids):
    """Fused gather + MLP forward.

    params[k] = (W, b) with W in PyTorch nn.Linear (out, in) layout; the last
    pair is the (1, H_last) output layer.
    """
    assert len(params) >= 2, "need at least one hidden layer plus out layer"
    n_hidden = len(params) - 1
    num_users, E = user_table.shape
    num_items, _ = item_table.shape
    w0, b0 = params[0]
    assert w0.shape[1] == 2 * E, "layers[0] must equal 2 * embedding_dim"
    h1 = w0.shape[0]

    # Fold the embedding tables through the first layer (tiny, wrapper-side):
    #   concat([ue, ie]) @ W0.T == (W0[:, :E] @ table_u.T)[:, uid]
    #                            + (W0[:, E:] @ table_i.T)[:, iid]
    nu_p = _round_up(num_users, 8)
    ni_p = _round_up(num_items, 8)
    w0f = w0.astype(jnp.float32)
    au = jnp.dot(w0f[:, :E], user_table.astype(jnp.float32).T)   # (H1, U)
    ai = jnp.dot(w0f[:, E:], item_table.astype(jnp.float32).T)   # (H1, I)
    au = jnp.pad(au, ((0, 0), (0, nu_p - num_users))).astype(jnp.bfloat16)
    ai = jnp.pad(ai, ((0, 0), (0, ni_p - num_items))).astype(jnp.bfloat16)
    # TODO(synk): for very large vocabularies the one-hot gather matmul stops
    # being cheap; switch to a per-tile manual DMA row gather from
    # memory_space=pl.ANY tables instead of VMEM-resident folded tables.

    flat = [au, ai, b0.reshape(-1, 1).astype(jnp.float32)]
    widths = [h1]
    for w, b in params[1:-1]:
        flat += [w, b.reshape(-1, 1).astype(jnp.float32)]
        widths.append(w.shape[0])
    w_out, b_out = params[-1]
    flat += [w_out.astype(jnp.float32).reshape(-1, 1),
             b_out.astype(jnp.float32).reshape(1, 1)]

    B = user_ids.shape[0]
    vmem_limit = _vmem_limit_bytes()
    tile_b = _pick_tile_b(B, nu_p, ni_p, widths, vmem_limit)
    num_blocks = pl.cdiv(B, tile_b)
    b_pad = num_blocks * tile_b

    # Only the cheap int32 ids are padded to a tile multiple; padded rows
    # produce garbage logits that are sliced off below.
    uids = jnp.pad(user_ids.astype(jnp.int32),
                   (0, b_pad - B)).reshape(num_blocks, tile_b)
    iids = jnp.pad(item_ids.astype(jnp.int32),
                   (0, b_pad - B)).reshape(num_blocks, tile_b)

    id_spec = pl.BlockSpec((1, tile_b), lambda i: (i, 0))
    param_specs = [pl.BlockSpec(p.shape, lambda i: (0, 0)) for p in flat]
    out_spec = pl.BlockSpec((1, tile_b), lambda i: (i, 0))

    flops = 2 * b_pad * (h1 * (nu_p + ni_p)
                         + sum(w.shape[0] * w.shape[1] for w, _ in params[1:]))
    bytes_accessed = (b_pad * (4 + 4 + 4)
                      + sum(int(p.size) * p.dtype.itemsize for p in flat))

    kernel = functools.partial(_mlp_kernel, n_hidden, nu_p, ni_p)
    out = pl.pallas_call(
        kernel,
        out_shape=jax.ShapeDtypeStruct((num_blocks, tile_b), jnp.float32),
        grid=(num_blocks,),
        in_specs=[id_spec, id_spec] + param_specs,
        out_specs=out_spec,
        compiler_params=pltpu.CompilerParams(
            # Batch axis is embarrassingly parallel (sharded across v7x's 2
            # TensorCores; no-op on v5e/v6e).
            # TODO(synk): confirm megacore sharding in the Mosaic dump on v7x
            # and switch to pltpu.CORE_PARALLEL if "parallel" does not split.
            dimension_semantics=("parallel",),
            vmem_limit_bytes=int(vmem_limit),
        ),
        cost_estimate=pl.CostEstimate(
            flops=int(flops),
            transcendentals=0,
            bytes_accessed=int(bytes_accessed)),
    )(uids, iids, *flat)

    return out.reshape(-1)[:B]          # logits.view(-1)


def init_params(key, num_users, num_items, embedding_dim, layers):
    """Deterministic synthetic parameters.

    Linear weights use PyTorch (out, in) layout.  Tables and weights are
    stored bf16 (HBM-traffic / MXU-rate optimization; kernel accumulates in
    f32, so results differ from an f32 reference only at bf16 precision);
    biases stay f32.
    """
    keys = jax.random.split(key, 2 + 2 * len(layers))
    user_table = jax.random.normal(
        keys[0], (num_users, embedding_dim), jnp.float32).astype(jnp.bfloat16)
    item_table = jax.random.normal(
        keys[1], (num_items, embedding_dim), jnp.float32).astype(jnp.bfloat16)

    dims = list(layers) + [1]           # hidden layers ... then out_layer -> 1
    params = []
    ki = 2
    for in_size, out_size in zip(dims[:-1], dims[1:]):
        bound = 1.0 / float(in_size) ** 0.5
        w = jax.random.uniform(
            keys[ki], (out_size, in_size), jnp.float32, -bound, bound
        ).astype(jnp.bfloat16)
        b = jax.random.uniform(
            keys[ki + 1], (out_size,), jnp.float32, -bound, bound)
        params.append((w, b))
        ki += 2
    return user_table, item_table, params


def mlp_reference(user_table, item_table, params, user_ids, item_ids):
    """Pure-JAX reference mirroring the kernel's bf16/f32 mixed precision."""
    ue = jnp.take(user_table, user_ids, axis=0)
    ie = jnp.take(item_table, item_ids, axis=0)
    x = jnp.concatenate([ue, ie], axis=1)
    for w, b in params[:-1]:
        x = jnp.dot(x.astype(w.dtype), w.T,
                    preferred_element_type=jnp.float32) + b
        x = jnp.maximum(x, 0.0)
    w_out, b_out = params[-1]
    out = jnp.dot(x.astype(w_out.dtype), w_out.T,
                  preferred_element_type=jnp.float32) + b_out
    return out.reshape(-1)


if __name__ == "__main__":
    num_users = 32
    num_items = 48
    embedding_dim = 16
    layers = [2 * embedding_dim, 64, 32, 16]   # layers[0] == 2 * embedding_dim
    batch = 8

    key = jax.random.PRNGKey(0)
    pkey, ukey, ikey = jax.random.split(key, 3)
    user_table, item_table, params = init_params(
        pkey, num_users, num_items, embedding_dim, layers)

    user_ids = jax.random.randint(ukey, (batch,), 0, num_users, dtype=jnp.int32)
    item_ids = jax.random.randint(ikey, (batch,), 0, num_items, dtype=jnp.int32)

    fwd = jax.jit(mlp_forward)
    logits = fwd(user_table, item_table, params, user_ids, item_ids)
    jax.block_until_ready(logits)

    ref = mlp_reference(user_table, item_table, params, user_ids, item_ids)
    assert logits.shape == (batch,)
    # bf16 weights + folded first layer reorder the f32 accumulations vs the
    # fused-concat reference, so compare at bf16-level tolerance.
    assert jnp.allclose(logits, ref, atol=2e-2, rtol=2e-2), (logits, ref)

    print("KERNEL_OK")
</pallas_src>

<mosaic_0001>
module attributes {stable_mosaic.version = 11 : i64} {
  func.func @_mlp_kernel(%arg0: i32, %arg1: memref<1x128xi32, #tpu.memory_space<vmem>>, %arg2: memref<1x128xi32, #tpu.memory_space<vmem>>, %arg3: memref<64x32xbf16, #tpu.memory_space<vmem>>, %arg4: memref<64x48xbf16, #tpu.memory_space<vmem>>, %arg5: memref<64x1xf32, #tpu.memory_space<vmem>>, %arg6: memref<32x64xbf16, #tpu.memory_space<vmem>>, %arg7: memref<32x1xf32, #tpu.memory_space<vmem>>, %arg8: memref<16x32xbf16, #tpu.memory_space<vmem>>, %arg9: memref<16x1xf32, #tpu.memory_space<vmem>>, %arg10: memref<16x1xf32, #tpu.memory_space<vmem>>, %arg11: memref<1x1xf32, #tpu.memory_space<vmem>>, %arg12: memref<1x128xf32, #tpu.memory_space<vmem>>) attributes {dimension_semantics = [#tpu.dimension_semantics<parallel>], iteration_bounds = array<i64: 1>, scalar_prefetch = 0 : i64, scratch_operands = 0 : i64, tpu.core_type = #tpu.core_type<tc>, window_params = [{transform_indices = @transform_0, window_bounds = array<i64: 1, 128>}, {transform_indices = @transform_1, window_bounds = array<i64: 1, 128>}, {pipeline_mode = #tpu.pipeline_mode<synchronous>, transform_indices = @transform_2, window_bounds = array<i64: 64, 32>}, {pipeline_mode = #tpu.pipeline_mode<synchronous>, transform_indices = @transform_3, window_bounds = array<i64: 64, 48>}, {pipeline_mode = #tpu.pipeline_mode<synchronous>, transform_indices = @transform_4, window_bounds = array<i64: 64, 1>}, {pipeline_mode = #tpu.pipeline_mode<synchronous>, transform_indices = @transform_5, window_bounds = array<i64: 32, 64>}, {pipeline_mode = #tpu.pipeline_mode<synchronous>, transform_indices = @transform_6, window_bounds = array<i64: 32, 1>}, {pipeline_mode = #tpu.pipeline_mode<synchronous>, transform_indices = @transform_7, window_bounds = array<i64: 16, 32>}, {pipeline_mode = #tpu.pipeline_mode<synchronous>, transform_indices = @transform_8, window_bounds = array<i64: 16, 1>}, {pipeline_mode = #tpu.pipeline_mode<synchronous>, transform_indices = @transform_9, window_bounds = array<i64: 16, 1>}, {pipeline_mode = #tpu.pipeline_mode<synchronous>, transform_indices = @transform_10, window_bounds = array<i64: 1, 1>}, {transform_indices = @transform_11, window_bounds = array<i64: 1, 128>}]} {
    %c0 = arith.constant 0 : index
    %c0_0 = arith.constant 0 : index
    %0 = vector.load %arg1[%c0, %c0_0] : memref<1x128xi32, #tpu.memory_space<vmem>>, vector<1x128xi32>
    %c0_1 = arith.constant 0 : index
    %c0_2 = arith.constant 0 : index
    %1 = vector.load %arg2[%c0_1, %c0_2] : memref<1x128xi32, #tpu.memory_space<vmem>>, vector<1x128xi32>
    %2 = tpu.iota {dimensions = array<i32: 0>} : vector<32x128xi32>
    %3 = vector.broadcast %0 : vector<1x128xi32> to vector<32x128xi32>
    %4 = arith.cmpi eq, %2, %3 : vector<32x128xi32>
    %5 = arith.extui %4 : vector<32x128xi1> to vector<32x128xi32>
    %6 = arith.sitofp %5 : vector<32x128xi32> to vector<32x128xf32>
    %7 = arith.truncf %6 : vector<32x128xf32> to vector<32x128xbf16>
    %8 = tpu.iota {dimensions = array<i32: 0>} : vector<48x128xi32>
    %9 = vector.broadcast %1 : vector<1x128xi32> to vector<48x128xi32>
    %10 = arith.cmpi eq, %8, %9 : vector<48x128xi32>
    %11 = arith.extui %10 : vector<48x128xi1> to vector<48x128xi32>
    %12 = arith.sitofp %11 : vector<48x128xi32> to vector<48x128xf32>
    %13 = arith.truncf %12 : vector<48x128xf32> to vector<48x128xbf16>
    %c0_3 = arith.constant 0 : index
    %c0_4 = arith.constant 0 : index
    %14 = vector.load %arg3[%c0_3, %c0_4] : memref<64x32xbf16, #tpu.memory_space<vmem>>, vector<64x32xbf16>
    %cst = arith.constant dense<0.000000e+00> : vector<64x128xf32>
    %15 = tpu.matmul %14, %7, %cst {dimension_numbers = #tpu.dot_dimension_numbers<[1], [0], [0], [1], [0, 0, 1, 1], [], []>} : vector<64x32xbf16>, vector<32x128xbf16>, vector<64x128xf32> -> vector<64x128xf32>
    %c0_5 = arith.constant 0 : index
    %c0_6 = arith.constant 0 : index
    %16 = vector.load %arg4[%c0_5, %c0_6] : memref<64x48xbf16, #tpu.memory_space<vmem>>, vector<64x48xbf16>
    %cst_7 = arith.constant dense<0.000000e+00> : vector<64x128xf32>
    %17 = tpu.matmul %16, %13, %cst_7 {dimension_numbers = #tpu.dot_dimension_numbers<[1], [0], [0], [1], [0, 0, 1, 1], [], []>} : vector<64x48xbf16>, vector<48x128xbf16>, vector<64x128xf32> -> vector<64x128xf32>
    %18 = arith.addf %15, %17 : vector<64x128xf32>
    %c0_8 = arith.constant 0 : index
    %c0_9 = arith.constant 0 : index
    %19 = vector.load %arg5[%c0_8, %c0_9] : memref<64x1xf32, #tpu.memory_space<vmem>>, vector<64x1xf32>
    %20 = vector.broadcast %19 : vector<64x1xf32> to vector<64x128xf32>
    %21 = arith.addf %18, %20 : vector<64x128xf32>
    %cst_10 = arith.constant 0.000000e+00 : f32
    %22 = vector.broadcast %cst_10 : f32 to vector<64x128xf32>
    %23 = arith.maximumf %21, %22 : vector<64x128xf32>
    %c0_11 = arith.constant 0 : index
    %c0_12 = arith.constant 0 : index
    %24 = vector.load %arg6[%c0_11, %c0_12] : memref<32x64xbf16, #tpu.memory_space<vmem>>, vector<32x64xbf16>
    %c0_13 = arith.constant 0 : index
    %c0_14 = arith.constant 0 : index
    %25 = vector.load %arg7[%c0_13, %c0_14] : memref<32x1xf32, #tpu.memory_space<vmem>>, vector<32x1xf32>
    %26 = arith.truncf %23 : vector<64x128xf32> to vector<64x128xbf16>
    %cst_15 = arith.constant dense<0.000000e+00> : vector<32x128xf32>
    %27 = tpu.matmul %24, %26, %cst_15 {dimension_numbers = #tpu.dot_dimension_numbers<[1], [0], [0], [1], [0, 0, 1, 1], [], []>} : vector<32x64xbf16>, vector<64x128xbf16>, vector<32x128xf32> -> vector<32x128xf32>
    %28 = vector.broadcast %25 : vector<32x1xf32> to vector<32x128xf32>
    %29 = arith.addf %27, %28 : vector<32x128xf32>
    %cst_16 = arith.constant 0.000000e+00 : f32
    %30 = vector.broadcast %cst_16 : f32 to vector<32x128xf32>
    %31 = arith.maximumf %29, %30 : vector<32x128xf32>
    %c0_17 = arith.constant 0 : index
    %c0_18 = arith.constant 0 : index
    %32 = vector.load %arg8[%c0_17, %c0_18] : memref<16x32xbf16, #tpu.memory_space<vmem>>, vector<16x32xbf16>
    %c0_19 = arith.constant 0 : index
    %c0_20 = arith.constant 0 : index
    %33 = vector.load %arg9[%c0_19, %c0_20] : memref<16x1xf32, #tpu.memory_space<vmem>>, vector<16x1xf32>
    %34 = arith.truncf %31 : vector<32x128xf32> to vector<32x128xbf16>
    %cst_21 = arith.constant dense<0.000000e+00> : vector<16x128xf32>
    %35 = tpu.matmul %32, %34, %cst_21 {dimension_numbers = #tpu.dot_dimension_numbers<[1], [0], [0], [1], [0, 0, 1, 1], [], []>} : vector<16x32xbf16>, vector<32x128xbf16>, vector<16x128xf32> -> vector<16x128xf32>
    %36 = vector.broadcast %33 : vector<16x1xf32> to vector<16x128xf32>
    %37 = arith.addf %35, %36 : vector<16x128xf32>
    %cst_22 = arith.constant 0.000000e+00 : f32
    %38 = vector.broadcast %cst_22 : f32 to vector<16x128xf32>
    %39 = arith.maximumf %37, %38 : vector<16x128xf32>
    %c0_23 = arith.constant 0 : index
    %c0_24 = arith.constant 0 : index
    %40 = vector.load %arg10[%c0_23, %c0_24] : memref<16x1xf32, #tpu.memory_space<vmem>>, vector<16x1xf32>
    %41 = vector.broadcast %40 : vector<16x1xf32> to vector<16x128xf32>
    %42 = arith.mulf %39, %41 : vector<16x128xf32>
    %cst_25 = arith.constant dense<0.000000e+00> : vector<128xf32>
    %43 = vector.multi_reduction <add>, %42, %cst_25 [0] : vector<16x128xf32> to vector<128xf32>
    %44 = vector.shape_cast %43 : vector<128xf32> to vector<1x128xf32>
    %c0_26 = arith.constant 0 : index
    %c0_27 = arith.constant 0 : index
    %45 = vector.load %arg11[%c0_26, %c0_27] : memref<1x1xf32, #tpu.memory_space<vmem>>, vector<1x1xf32>
    %46 = vector.broadcast %45 : vector<1x1xf32> to vector<1x128xf32>
    %47 = arith.addf %44, %46 : vector<1x128xf32>
    %c0_28 = arith.constant 0 : index
    %c0_29 = arith.constant 0 : index
    %48 = vector.load %arg12[%c0_28, %c0_29] : memref<1x128xf32, #tpu.memory_space<vmem>>, vector<1x128xf32>
    tpu.vector_store %arg12[%c0_28, %c0_29], %47 {strides = array<i32>} : memref<1x128xf32, #tpu.memory_space<vmem>>, vector<1x128xf32>,
    return
  }
  func.func @transform_0(%arg0: i32) -> (i32, i32) {
    %c0_i32 = arith.constant 0 : i32
    %c0_i32_0 = arith.constant 0 : i32
    return %arg0, %c0_i32 : i32, i32
  }
  func.func @transform_1(%arg0: i32) -> (i32, i32) {
    %c0_i32 = arith.constant 0 : i32
    %c0_i32_0 = arith.constant 0 : i32
    return %arg0, %c0_i32 : i32, i32
  }
  func.func @transform_2(%arg0: i32) -> (i32, i32) {
    %c0_i32 = arith.constant 0 : i32
    %c0_i32_0 = arith.constant 0 : i32
    %c0_i32_1 = arith.constant 0 : i32
    return %c0_i32, %c0_i32_0 : i32, i32
  }
  func.func @transform_3(%arg0: i32) -> (i32, i32) {
    %c0_i32 = arith.constant 0 : i32
    %c0_i32_0 = arith.constant 0 : i32
    %c0_i32_1 = arith.constant 0 : i32
    return %c0_i32, %c0_i32_0 : i32, i32
  }
  func.func @transform_4(%arg0: i32) -> (i32, i32) {
    %c0_i32 = arith.constant 0 : i32
    %c0_i32_0 = arith.constant 0 : i32
    %c0_i32_1 = arith.constant 0 : i32
    return %c0_i32, %c0_i32_0 : i32, i32
  }
  func.func @transform_5(%arg0: i32) -> (i32, i32) {
    %c0_i32 = arith.constant 0 : i32
    %c0_i32_0 = arith.constant 0 : i32
    %c0_i32_1 = arith.constant 0 : i32
    return %c0_i32, %c0_i32_0 : i32, i32
  }
  func.func @transform_6(%arg0: i32) -> (i32, i32) {
    %c0_i32 = arith.constant 0 : i32
    %c0_i32_0 = arith.constant 0 : i32
    %c0_i32_1 = arith.constant 0 : i32
    return %c0_i32, %c0_i32_0 : i32, i32
  }
  func.func @transform_7(%arg0: i32) -> (i32, i32) {
    %c0_i32 = arith.constant 0 : i32
    %c0_i32_0 = arith.constant 0 : i32
    %c0_i32_1 = arith.constant 0 : i32
    return %c0_i32, %c0_i32_0 : i32, i32
  }
  func.func @transform_8(%arg0: i32) -> (i32, i32) {
    %c0_i32 = arith.constant 0 : i32
    %c0_i32_0 = arith.constant 0 : i32
    %c0_i32_1 = arith.constant 0 : i32
    return %c0_i32, %c0_i32_0 : i32, i32
  }
  func.func @transform_9(%arg0: i32) -> (i32, i32) {
    %c0_i32 = arith.constant 0 : i32
    %c0_i32_0 = arith.constant 0 : i32
    %c0_i32_1 = arith.constant 0 : i32
    return %c0_i32, %c0_i32_0 : i32, i32
  }
  func.func @transform_10(%arg0: i32) -> (i32, i32) {
    %c0_i32 = arith.constant 0 : i32
    %c0_i32_0 = arith.constant 0 : i32
    %c0_i32_1 = arith.constant 0 : i32
    return %c0_i32, %c0_i32_0 : i32, i32
  }
  func.func @transform_11(%arg0: i32) -> (i32, i32) {
    %c0_i32 = arith.constant 0 : i32
    %c0_i32_0 = arith.constant 0 : i32
    return %arg0, %c0_i32 : i32, i32
  }
}

</mosaic_0001>

<bundles_post_ra>
// kernel: mlp_forward.1
= control target key start
LH: loop header
LB: loop body
LE: loop exit
PB: predicated region body
PF: predicated region fallthrough
CT: control target
= control target key end

     0   :  { %v43_v0 = vlaneseq  ;;  %vm227_vm0 = vcmask 261120   ;;  %vm906_vm1 = vcmask 392192   ;;  %v712_v9 = vmov 0   ;;  %s894_s1 = inlined_call_operand.vmem [shape: s32[1,128], index: 1, kind: input, shape index: {}]   ;;  %s895_s0 = inlined_call_operand.vmem [shape: s32[1,128], index: 0, kind: input, shape index: {}]   ;;  %s896_s2 = inlined_call_operand.vmem [shape: bf16[64,32], index: 2, kind: input, shape index: {}]   ;;  %s897_s10 = inlined_call_operand.<no memory space> [shape: f32[1,1], index: 10, kind: input, shape index: {}]   ;;  %s898_s3 = inlined_call_operand.vmem [shape: bf16[64,48], index: 3, kind: input, shape index: {}]   ;;  %s899_s4 = inlined_call_operand.vmem [shape: f32[64,1], index: 4, kind: input, shape index: {}]   ;;  %s900_s6 = inlined_call_operand.vmem [shape: f32[32,1], index: 6, kind: input, shape index: {}]   ;;  %s901_s8 = inlined_call_operand.vmem [shape: f32[16,1], index: 8, kind: input, shape index: {}]   ;;  %s902_s9 = inlined_call_operand.vmem [shape: f32[16,1], index: 9, kind: input, shape index: {}]   ;;  %s903_s5 = inlined_call_operand.vmem [shape: bf16[32,64], index: 5, kind: input, shape index: {}]   ;;  %s904_s7 = inlined_call_operand.vmem [shape: bf16[16,32], index: 7, kind: input, shape index: {}]   ;;  %s905_s11 = inlined_call_operand.vmem [shape: f32[1,128], index: 11, kind: output, shape index: {}]  }
   0x1   :  { %v580_v1 = vld [vmem:[%s894_s1] ss:$0 sm:$0xff]  ;;  %v16_v3 = vstv %s897_s10  ;;  %699 = vset.pattern.permute.xlu0 %v712_v9  ;;  %700 = vset.pattern.permute.xlu1 %v712_v9  ;;  %v713_v13 = vmov 1.0|1.0   ;;  %v307_v15 = vld [vmem:[%s899_s4 + $0x10] sm:$0xff]  ;;  %v702_v16 = vld [vmem:[%s896_s2 + $0x8] sm:$0xff]  }
   0x2   :  { %v575_v2 = vld [vmem:[%s895_s0] ss:$0 sm:$0xff]  ;;  %v785_v4 = vshrl.u32 %v43_v0, 7  ;;  %17 = vst [vmem:[#allocation2] sm:$0x1] %v16_v3  ;;  %v306_v17 = vld [vmem:[%s899_s4 + $0x8] sm:$0xff]  ;;  %325 = vperm.xlu1 %700, %v307_v15  }
   0x3   :  { %v701_v5 = vld [vmem:[%s896_s2] sm:$0xff]   ;;  %v705_v18 = vld [vmem:[%s896_s2 + $0x10] sm:$0xff]   ;;  %v308_v19 = vld [vmem:[%s899_s4 + $0x18] sm:$0xff] }
   0x4   :  { %v45_v6 = vadd.s32 8, %v785_v4  ;;  %vm72_vm2 = vcmp.eq.s32.totalorder %v785_v4, %v580_v1  ;;  %v46_v7 = vadd.s32 16, %v785_v4  ;;  %659 = vmatprep.mubr.msk.bf16.mxu1 %vm227_vm0, %v701_v5  ;;  %v703_v8 = vld [vmem:[%s898_s3] sm:$0xff]   ;;  %vm52_vm3 = vcmp.eq.s32.totalorder %v785_v4, %v575_v2  ;;  %v704_v20 = vld [vmem:[%s898_s3 + $0x8] sm:$0xff]   ;;  %v707_v21 = vld [vmem:[%s898_s3 + $0x10] sm:$0xff]  }
   0x5   :  { %v47_v10 = vadd.s32 24, %v785_v4  ;;  %v66_v11 = vadd.s32 32, %v785_v4  ;;  %v67_v12 = vadd.s32 40, %v785_v4  ;;  %647 = vmatprep.mubr.msk.bf16.mxu0 %vm906_vm1, %v703_v8  ;;  %v305_v14 = vld [vmem:[%s899_s4] sm:$0xff]  ;;  %v310_v23 = vld [vmem:[%s899_s4 + $0x28] sm:$0xff]  ;;  %v706_v24 = vld [vmem:[%s896_s2 + $0x18] sm:$0xff]  }
   0x6   :  { %vm73_vm4 = vcmp.eq.s32.totalorder %v45_v6, %v580_v1  ;;  %vm53_vm5 = vcmp.eq.s32.totalorder %v45_v6, %v575_v2  ;;  %vm74_vm6 = vcmp.eq.s32.totalorder %v46_v7, %v580_v1  ;;  %vm54_vm9 = vcmp.eq.s32.totalorder %v46_v7, %v575_v2  ;;  %315 = vperm.xlu0 %699, %v305_v14   ;;  %v309_v22 = vld [vmem:[%s899_s4 + $0x20] sm:$0xff]  ;;  %v311_v25 = vld [vmem:[%s899_s4 + $0x30] sm:$0xff]  ;;  %v312_v26 = vld [vmem:[%s899_s4 + $0x38] sm:$0xff] }
   0x7   :  { %vm591_vm7 = vmpackc.low %vm73_vm4, %vm72_vm2  ;;  %vm75_vm8 = vcmp.eq.s32.totalorder %v47_v10, %v580_v1  ;;  %vm55_vm10 = vcmp.eq.s32.totalorder %v47_v10, %v575_v2  ;;  %vm76_vm12 = vcmp.eq.s32.totalorder %v66_v11, %v580_v1  ;;  %vm77_vm13 = vcmp.eq.s32.totalorder %v67_v12, %v580_v1  ;;  %330 = vperm.xlu1 %700, %v308_v19   ;;  %v708_v27 = vld [vmem:[%s898_s3 + $0x18] sm:$0xff]   ;;  %v373_v28 = vld [vmem:[%s900_s6] sm:$0xff] }
   0x8   :  { %641 = vmatprep.subr.msk.bf16.mxu0 %vm591_vm7, %v713_v13  ;;  %vm605_vm11 = vmpackc.low %vm53_vm5, %vm52_vm3  ;;  %vm907_vm2 = vcmask 392192   ;;  %v374_v29 = vld [vmem:[%s900_s6 + $0x8] sm:$0xff]  ;;  %v375_v30 = vld [vmem:[%s900_s6 + $0x10] sm:$0xff]  ;;  %vm411_vm4 = vcmask 523264   ;;  %vm715_vm5 = vmmov 0  }
   0x9   :  { %642 = vmatpush3.bf16.msk.msra.mxu0 %vm591_vm7, %v713_v13  ;;  %655 = vmatprep.subr.msk.bf16.mxu1 %vm605_vm11, %v713_v13  ;;  %vm593_vm14 = vmpackc.low %vm75_vm8, %vm74_vm6  ;;  %v376_v31 = vld [vmem:[%s900_s6 + $0x18] sm:$0xff]  ;;  %v473_v32 = vld [vmem:[%s901_s8] sm:$0xff] }
   0xa   :  { %656 = vmatpush3.bf16.msk.msra.mxu1 %vm605_vm11, %v713_v13  ;;  %643 = vmatprep.subr.msk.bf16.mxu0 %vm593_vm14, %v713_v13  ;;  %vm607_vm15 = vmpackc.low %vm55_vm10, %vm54_vm9  ;;  %v474_v33 = vld [vmem:[%s901_s8 + $0x8] sm:$0xff]  ;;  %v538_v34 = vld [vmem:[%s902_s9] sm:$0xff] }
   0xb   :  { %657 = vmatprep.subr.msk.bf16.mxu1 %vm607_vm15, %v713_v13  ;;  %vm595_vm1 = vmpackc.low %vm77_vm13, %vm76_vm12  ;;  %320 = vperm.xlu0 %699, %v306_v17   ;;  %v539_v35 = vld [vmem:[%s902_s9 + $0x8] sm:$0xff]  ;;  %v559_v36 = vld [vmem:[#allocation2] sm:$0x1] }
   0xc   :  { %340 = vperm.xlu1 %700, %v310_v23   ;;  %v709_v37 = vld [vmem:[%s903_s5] sm:$0xff]  }
   0xd   :  { %644 = vmatpush3.bf16.msk.msra.mxu0 %vm593_vm14, %v713_v13 }
   0xe   :  { %658 = vmatpush3.bf16.msk.msra.mxu1 %vm607_vm15, %v713_v13  ;;  %645 = vmatprep.subr.msk.bf16.mxu0 %vm595_vm1, %v713_v13 }
   0xf   :  { %335 = vperm.xlu0 %699, %v309_v22  }
  0x10   :  { %350 = vperm.xlu1 %700, %v312_v26  }
  0x11   :  { %646 = vmatpush3.bf16.msk.msra.mxu0 %vm595_vm1, %v713_v13  ;;  %660 = vmatmul.mubr.msk.bf16.vlgmr.msra.gmra.mrb[0].mxu1 %vm227_vm0, %v702_v16  ;;  %vm908_vm1 = vmmov %vm907_vm2 }
  0x12   :  { %663 = vmatprep.mubr.msk.bf16.mxu1 %vm227_vm0, %v705_v18  ;;  %vm909_vm3 = vmmov %vm908_vm1 }
  0x13   :  { %345 = vperm.xlu0 %699, %v311_v25  }
  0x14   :  { %648 = vmatmul.mubr.msk.bf16.vlgmr.msra.gmra.mrb[0].mxu0 %vm907_vm2, %v704_v20  ;;  %388 = vperm.xlu1 %700, %v374_v29  }
  0x15   :  { %651 = vmatprep.mubr.msk.bf16.mxu0 %vm908_vm1, %v707_v21 }
  0x17   :  { %383 = vperm.xlu0 %699, %v373_v28   ;;  %v714_v28 = vmov 0.0  }
  0x18   :  { %398 = vperm.xlu1 %700, %v376_v31   ;;  %679 = vmatprep.subr.bf16.mxu1 %v714_v28 }
  0x19   :  { %664 = vmatmul.mubr.msk.bf16.gmra.mrb[4].mxu1 %vm227_vm0, %v706_v24 }
  0x1a   :  { %683 = vmatprep.mubr.msk.bf16.mxu1 %vm715_vm5, %v714_v28 }
  0x1b   :  { %393 = vperm.xlu0 %699, %v375_v30  }
  0x1c   :  { %652 = vmatmul.mubr.msk.bf16.gmra.mrb[4].mxu0 %vm909_vm3, %v708_v27  ;;  %484 = vperm.xlu1 %700, %v474_v33   ;;  %v710_v27 = vld [vmem:[%s903_s5 + $0x8] sm:$0xff]  }
  0x1d   :  { %675 = vmatprep.mubr.msk.bf16.mxu0 %vm411_vm4, %v709_v37 }
  0x1f   :  { %479 = vperm.xlu0 %699, %v473_v32  }
  0x20   :  { %547 = vperm.xlu1 %700, %v539_v35  }
  0x23   :  { %542 = vperm.xlu0 %699, %v538_v34  }
  0x27   :  { %562 = vperm.xlu0 %699, %v559_v36  }
  0x81   :  { %v326_v39 = vpop.permute.xlu1 %325 }
  0x85   :  { %v316_v38 = vpop.permute.xlu0 %315 }
  0x86   :  { %v331_v43 = vpop.permute.xlu1 %330 }
  0x8a   :  { %v321_v41 = vpop.permute.xlu0 %320 }
  0x8b   :  { %v341_v59 = vpop.permute.xlu1 %340 }
  0x8e   :  { %v336_v54 = vpop.permute.xlu0 %335 }
  0x8f   :  { %v351_v16 = vpop.permute.xlu1 %350 }
  0x92   :  { %v346_v9 = vpop.permute.xlu0 %345 }
  0x93   :  { %v389_v30 = vpop.permute.xlu1 %388 }
  0x96   :  { %v384_v29 = vpop.permute.xlu0 %383 }
  0x97   :  { %v399_v35 = vpop.permute.xlu1 %398 }
  0x9a   :  { %v394_v31 = vpop.permute.xlu0 %393 }
  0xe4   :  { %v661_v40 = vpop.f32.mrb[0].mxu1 }
  0xe5   :  { %v274_v42 = vpop.f32.mrb[1].mxu1 }
  0xe6   :  { %v662_v44 = vpop.f32.mrb[2].mxu1 }
  0xe7   :  { %v649_v45 = vpop.f32.mrb[0].mxu0  ;;  %v277_v46 = vpop.f32.mrb[3].mxu1 }
  0xe8   :  { %v283_v47 = vadd.f32 %v661_v40, %v649_v45  ;;  %v176_v48 = vpop.f32.mrb[1].mxu0 }
  0xe9   :  { %v275_v49 = vadd.f32 %v274_v42, %v176_v48  ;;  %v650_v50 = vpop.f32.mrb[2].mxu0  ;;  %v480_v48 = vpop.permute.xlu0 %479 }
  0xea   :  { %v355_v51 = vadd.f32 %v326_v39, %v283_v47  ;;  %v286_v52 = vadd.f32 %v662_v44, %v650_v50  ;;  %v179_v53 = vpop.f32.mrb[3].mxu0  ;;  %v711_v47 = vld [vmem:[%s904_s7] sm:$0xff]  }
  0xeb   :  { %v353_v55 = vadd.f32 %v316_v38, %v275_v49  ;;  %v278_v56 = vadd.f32 %v277_v46, %v179_v53  ;;  %v485_v49 = vpop.permute.xlu1 %484 }
  0xec   :  { %v356_v57 = vadd.f32 %v331_v43, %v286_v52  ;;  %v665_v58 = vpop.f32.mrb[4].mxu1  ;;  %v363_v62 = vmax.f32 %v355_v51, 0.0 }
  0xed   :  { %v354_v60 = vadd.f32 %v321_v41, %v278_v56  ;;  %v290_v61 = vpop.f32.mrb[5].mxu1  ;;  %v361_v1 = vmax.f32 %v353_v55, 0.0 }
  0xee   :  { %v364_v63 = vmax.f32 %v356_v57, 0.0  ;;  %v666_v0 = vpop.f32.mrb[6].mxu1 }
  0xef   :  { %v362_v2 = vmax.f32 %v354_v60, 0.0  ;;  %v653_v3 = vpop.f32.mrb[4].mxu0  ;;  %v293_v5 = vpop.f32.mrb[7].mxu1 }
  0xf0   :  { %v299_v6 = vadd.f32 %v665_v58, %v653_v3  ;;  %v192_v7 = vpop.f32.mrb[5].mxu0  ;;  %v378_v8 = vpack.c.bf16 %v364_v63, %v363_v62  ;;  %v543_v58 = vpop.permute.xlu0 %542 }
  0xf1   :  { %v291_v10 = vadd.f32 %v290_v61, %v192_v7  ;;  %v654_v11 = vpop.f32.mrb[6].mxu0  ;;  %v377_v12 = vpack.c.bf16 %v362_v2, %v361_v1  ;;  %v567_v2 = vsub.s32 0, %v785_v4 }
  0xf2   :  { %v359_v13 = vadd.f32 %v346_v9, %v299_v6  ;;  %v302_v14 = vadd.f32 %v666_v0, %v654_v11  ;;  %v195_v15 = vpop.f32.mrb[7].mxu0 }
  0xf3   :  { %v357_v17 = vadd.f32 %v336_v54, %v291_v10  ;;  %v294_v18 = vadd.f32 %v293_v5, %v195_v15  ;;  %667 = vmatprep.subr.bf16.mxu0 %v377_v12 }
  0xf4   :  { %v360_v19 = vadd.f32 %v351_v16, %v302_v14  ;;  %668 = vmatpush3.bf16.msra.mxu0 %v377_v12  ;;  %v367_v21 = vmax.f32 %v359_v13, 0.0  ;;  %v563_v5 = vpop.permute.xlu0 %562 }
  0xf5   :  { %v358_v20 = vadd.f32 %v341_v59, %v294_v18  ;;  %669 = vmatprep.subr.bf16.mxu0 %v378_v8  ;;  %v365_v23 = vmax.f32 %v357_v17, 0.0  ;;  %v548_v59 = vpop.permute.xlu1 %547  ;;  %v568_v7 = vrot.slane %v563_v5, %v567_v2 }
  0xf6   :  { %v368_v22 = vmax.f32 %v360_v19, 0.0 }
  0xf7   :  { %v366_v24 = vmax.f32 %v358_v20, 0.0 }
  0xf8   :  { %670 = vmatpush3.bf16.msra.mxu0 %v378_v8  ;;  %v380_v25 = vpack.c.bf16 %v368_v22, %v367_v21 }
  0xf9   :  { %v379_v26 = vpack.c.bf16 %v366_v24, %v365_v23 }
  0xfb   :  { %671 = vmatprep.subr.bf16.mxu0 %v379_v26 }
  0xfc   :  { %672 = vmatpush3.bf16.msra.mxu0 %v379_v26 }
  0xfd   :  { %673 = vmatprep.subr.bf16.mxu0 %v380_v25 }
 0x100   :  { %674 = vmatpush3.bf16.msra.mxu0 %v380_v25 }
 0x103   :  { %676 = vmatmul.mubr.msk.bf16.vlgmr.msra.gmra.mrb[8].mxu0 %vm411_vm4, %v710_v27 }
 0x1d6   :  { %v677_v32 = vpop.f32.mrb[8].mxu0 }
 0x1d7   :  { %v461_v33 = vadd.f32 %v677_v32, %v394_v31  ;;  %v452_v34 = vpop.f32.mrb[9].mxu0 }
 0x1d8   :  { %v453_v36 = vadd.f32 %v452_v34, %v384_v29  ;;  %v678_v37 = vpop.f32.mrb[10].mxu0 }
 0x1d9   :  { %v464_v38 = vadd.f32 %v678_v37, %v399_v35  ;;  %v455_v39 = vpop.f32.mrb[11].mxu0  ;;  %v469_v41 = vmax.f32 %v461_v33, 0.0 }
 0x1da   :  { %v456_v40 = vadd.f32 %v455_v39, %v389_v30  ;;  %v467_v43 = vmax.f32 %v453_v36, 0.0 }
 0x1db   :  { %v470_v42 = vmax.f32 %v464_v38, 0.0 }
 0x1dc   :  { %v468_v44 = vmax.f32 %v456_v40, 0.0 }
 0x1dd   :  { %v476_v45 = vpack.c.bf16 %v470_v42, %v469_v41 }
 0x1de   :  { %v475_v46 = vpack.c.bf16 %v468_v44, %v467_v43 }
 0x1e0   :  { %680 = vmatpush3.bf16.msra.mxu1 %v475_v46 }
 0x1e1   :  { %681 = vmatprep.subr.bf16.mxu1 %v714_v28 }
 0x1e4   :  { %682 = vmatpush3.bf16.msra.mxu1 %v476_v45 }
 0x1e7   :  { %684 = vmatmul.mubr.msk.bf16.vlgmr.msra.gmra.mrb[8].mxu1 %vm227_vm0, %v711_v47 }
 0x2ba   :  { %v529_v50 = vpop.f32.mrb[8].mxu1 }
 0x2bb   :  { %v530_v51 = vadd.f32 %v529_v50, %v480_v48  ;;  %v685_v52 = vpop.f32.mrb[9].mxu1 }
 0x2bc   :  { %v532_v53 = vpop.f32.mrb[10].mxu1 }
 0x2bd   :  { %v536_v54 = vmax.f32 %v530_v51, 0.0  ;;  %v533_v55 = vadd.f32 %v532_v53, %v485_v49  ;;  %v686_v56 = vpop.f32.mrb[11].mxu1 }
 0x2bf   :  { %v537_v57 = vmax.f32 %v533_v55, 0.0  ;;  %v550_v60 = vmul.f32 %v543_v58, %v536_v54 }
 0x2c1   :  { %v551_v61 = vmul.f32 %v548_v59, %v537_v57 }
 0x2c3   :  { %v552_v62 = vadd.f32 %v551_v61, %v550_v60 }
 0x2c5   :  { %v553_v63 = vrot.slane %v552_v62, 4 }
 0x2c7   :  { %v554_v0 = vadd.f32 %v553_v63, %v552_v62 }
 0x2c9   :  { %v555_v1 = vrot.slane %v554_v0, 2 }
 0x2cb   :  { %v556_v3 = vadd.f32 %v555_v1, %v554_v0 }
 0x2cd   :  { %v557_v6 = vrot.slane %v556_v3, 1 }
 0x2cf   :  { %v558_v8 = vadd.f32 %v557_v6, %v556_v3 }
 0x2d1   :  { %v569_v9 = vadd.f32 %v568_v7, %v558_v8 }
 0x2d3   :  { %570 = vst [vmem:[%s905_s11] sm:$0x1] %v569_v9 }

</bundles_post_ra>
